<compile_context>
chip_gen: v6e
topology: v6e:2x2x1
jax: 0.10.0
libtpu: 0.0.40
codegen_flags: <defaults>
</compile_context>

<pallas_src>
import functools

import jax
import jax.numpy as jnp
from jax.experimental import pallas as pl
from jax.experimental.pallas import tpu as pltpu

_LANE = 128
_TILE_N_MAX = 32768      # columns (lane axis) per grid step
_NUM_OUTER = 2           # leading 'parallel' grid axis -> 2 TensorCores on v7x


def _round_up(x, m):
    return ((x + m - 1) // m) * m


def _make_kernel(beta, loss_weight, lambda_weight, n_valid, n_cls, tile_n):
    inv_total = 1.0 / float(n_valid * n_cls)   # reduction='mean' denominator
    inv_2beta = 0.5 / beta
    half_beta = 0.5 * beta

    def kernel(pred_ref, tgt_ref, out_ref, acc_sl1, acc_kl):
        o = pl.program_id(0)
        i = pl.program_id(1)
        k_inner = pl.num_programs(1)

        @pl.when(i == 0)
        def _init():
            acc_sl1[...] = jnp.zeros_like(acc_sl1)
            acc_kl[...] = jnp.zeros_like(acc_kl)

        x0 = pred_ref[0].astype(jnp.float32)      # (C, T) orig
        x1 = pred_ref[1].astype(jnp.float32)      # (C, T) aug1
        x2 = pred_ref[2].astype(jnp.float32)      # (C, T) aug2
        tgt = tgt_ref[...].astype(jnp.float32)    # (C, T)

        # Column-validity mask (N was zero-padded to a tile multiple).
        col0 = (o * k_inner + i) * tile_n
        cols = col0 + jax.lax.broadcasted_iota(jnp.int32, (1, tile_n), 1)
        valid = cols < n_valid                    # (1, T), broadcasts over C

        # ---- smooth L1 on the orig chunk vs target (elementwise) -----------
        diff = jnp.abs(x0 - tgt)
        sl1 = jnp.where(diff < beta, diff * diff * inv_2beta, diff - half_beta)
        acc_sl1[...] += jnp.where(valid, sl1, 0.0)

        # ---- JSD: log-softmax over C (sublane axis 0); lanes = samples -----
        def log_softmax(x):
            m = jnp.max(x, axis=0, keepdims=True)       # (1, T)
            z = x - m
            e = jnp.exp(z)
            s = jnp.sum(e, axis=0, keepdims=True)       # (1, T)
            return e * (1.0 / s), z - jnp.log(s)        # p, log p

        p0, lp0 = log_softmax(x0)
        p1, lp1 = log_softmax(x1)
        p2, lp2 = log_softmax(x2)

        mix = jnp.clip((p0 + p1 + p2) * (1.0 / 3.0), 1e-7, 1.0)
        log_mix = jnp.log(mix)

        # F.kl_div(log_mix, p, 'batchmean') with batch dim 1 == plain sum.
        kl = (p0 * (lp0 - log_mix)
              + p1 * (lp1 - log_mix)
              + p2 * (lp2 - log_mix))
        acc_kl[...] += jnp.where(valid, kl, 0.0)

        # ---- finalize: one cross-lane reduce + scalar combine per core ------
        @pl.when(i == k_inner - 1)
        def _finalize():
            sl1_sum = jnp.sum(acc_sl1[...])
            kl_sum = jnp.sum(acc_kl[...])
            partial = (loss_weight * sl1_sum * inv_total
                       + lambda_weight * kl_sum * (1.0 / 3.0))
            out_ref[...] = jnp.full(out_ref.shape, partial, dtype=out_ref.dtype)

    return kernel


@functools.partial(jax.jit, static_argnames=("beta", "loss_weight", "lambda_weight"))
def smooth_l1_loss_plus(pred, target, *, beta=1.0, loss_weight=1.0,
                        lambda_weight=1e-4):
    """pred/target: (3N, C) float arrays, rows = [orig; aug1; aug2]. Scalar f32."""
    n3, c = pred.shape
    assert n3 % 3 == 0, "pred must stack [orig; aug1; aug2] along axis 0"
    n = n3 // 3
    if n == 0:
        # TODO(synk): torch path returns pred_orig.sum()*0 (grad trick); value is 0.
        return jnp.zeros((), jnp.float32)

    # Lane-dense layout: N on the lane (last) axis, C on sublanes. One transpose
    # pass in the wrapper; pred is then passed to the kernel exactly once.
    pred3 = jnp.transpose(pred.reshape(3, n, c), (0, 2, 1))   # (3, C, N)
    tgt = jnp.transpose(target[:n], (1, 0))                   # (C, N)

    # Tile selection: split N over the two parallel-grid halves, pick the
    # largest lane-aligned tile <= _TILE_N_MAX, pad N so the grid divides evenly.
    per_half = -(-n // _NUM_OUTER)
    k_inner = max(1, -(-per_half // _TILE_N_MAX))
    tile_n = max(_LANE, _round_up(-(-per_half // k_inner), _LANE))
    n_padded = _NUM_OUTER * k_inner * tile_n
    pad = n_padded - n
    if pad:
        pred3 = jnp.pad(pred3, ((0, 0), (0, 0), (0, pad)))
        tgt = jnp.pad(tgt, ((0, 0), (0, pad)))

    kernel = _make_kernel(float(beta), float(loss_weight), float(lambda_weight),
                          n, c, tile_n)

    out = pl.pallas_call(
        kernel,
        out_shape=jax.ShapeDtypeStruct((_NUM_OUTER, 8, _LANE), jnp.float32),
        grid=(_NUM_OUTER, k_inner),
        in_specs=[
            pl.BlockSpec((3, c, tile_n), lambda o, i: (0, 0, o * k_inner + i)),
            pl.BlockSpec((c, tile_n), lambda o, i: (0, o * k_inner + i)),
        ],
        out_specs=pl.BlockSpec((1, 8, _LANE), lambda o, i: (o, 0, 0)),
        scratch_shapes=[
            pltpu.VMEM((c, tile_n), jnp.float32),   # smooth-L1 partials
            pltpu.VMEM((c, tile_n), jnp.float32),   # KL partials
        ],
        compiler_params=pltpu.CompilerParams(
            dimension_semantics=("parallel", "arbitrary"),
            vmem_limit_bytes=32 * 1024 * 1024,
        ),
    )(pred3, tgt)

    # Sum the per-core partial losses (out row o holds that core's partial).
    return jnp.sum(out[:, 0, 0])


def _reference(pred, target, beta=1.0, loss_weight=1.0, lambda_weight=1e-4):
    n = pred.shape[0] // 3
    po, pa1, pa2 = pred[:n], pred[n:2 * n], pred[2 * n:]
    t = target[:n]
    diff = jnp.abs(po - t)
    sl1 = jnp.where(diff < beta, 0.5 * diff * diff / beta, diff - 0.5 * beta).mean()
    sm = lambda x: jax.nn.softmax(x, axis=-1)
    pc, p1, p2 = sm(po), sm(pa1), sm(pa2)
    mix = jnp.clip((pc + p1 + p2) / 3.0, 1e-7, 1.0)
    logm = jnp.log(mix)
    kl = lambda p: jnp.sum(p * (jnp.log(p) - logm))
    jsd = (kl(pc) + kl(p1) + kl(p2)) / 3.0
    return loss_weight * sl1 + lambda_weight * jsd


if __name__ == "__main__":
    key = jax.random.PRNGKey(0)
    k1, k2 = jax.random.split(key)

    N_PER_CHUNK = 50   # boxes per chunk (not a multiple of 128 -> exercises padding/masking)
    C = 4              # bbox regression dim
    pred = jax.random.normal(k1, (3 * N_PER_CHUNK, C), dtype=jnp.float32)
    target = jax.random.normal(k2, (3 * N_PER_CHUNK, C), dtype=jnp.float32)

    loss = smooth_l1_loss_plus(pred, target, beta=1.0, loss_weight=1.0,
                               lambda_weight=1e-4)
    loss = jax.block_until_ready(loss)

    ref = _reference(pred, target)
    assert jnp.allclose(loss, ref, rtol=1e-4, atol=1e-5), (loss, ref)
    print("KERNEL_OK")
</pallas_src>

<mosaic_0001>
module attributes {stable_mosaic.version = 11 : i64} {
  func.func @kernel(%arg0: i32, %arg1: i32, %arg2: memref<3x4x128xf32, #tpu.memory_space<vmem>>, %arg3: memref<4x128xf32, #tpu.memory_space<vmem>>, %arg4: memref<1x8x128xf32, #tpu.memory_space<vmem>>, %arg5: memref<4x128xf32, #tpu.memory_space<vmem>>, %arg6: memref<4x128xf32, #tpu.memory_space<vmem>>) attributes {dimension_semantics = [#tpu.dimension_semantics<parallel>, #tpu.dimension_semantics<arbitrary>], iteration_bounds = array<i64: 2, 1>, scalar_prefetch = 0 : i64, scratch_operands = 2 : i64, tpu.core_type = #tpu.core_type<tc>, window_params = [{transform_indices = @transform_0, window_bounds = array<i64: 3, 4, 128>}, {transform_indices = @transform_1, window_bounds = array<i64: 4, 128>}, {transform_indices = @transform_2, window_bounds = array<i64: 1, 8, 128>}]} {
    %c0_i32 = arith.constant 0 : i32
    %0 = arith.cmpi eq, %arg1, %c0_i32 : i32
    %1 = arith.extui %0 : i1 to i32
    %c0_i32_0 = arith.constant 0 : i32
    %2 = arith.cmpi ne, %1, %c0_i32_0 : i32
    scf.if %2 {
      %cst_35 = arith.constant 0.000000e+00 : f32
      %104 = vector.broadcast %cst_35 : f32 to vector<4x128xf32>
      %c0_36 = arith.constant 0 : index
      %c0_37 = arith.constant 0 : index
      %105 = vector.load %arg5[%c0_36, %c0_37] : memref<4x128xf32, #tpu.memory_space<vmem>>, vector<4x128xf32>
      tpu.vector_store %arg5[%c0_36, %c0_37], %104 {strides = array<i32>} : memref<4x128xf32, #tpu.memory_space<vmem>>, vector<4x128xf32>,
      %cst_38 = arith.constant 0.000000e+00 : f32
      %106 = vector.broadcast %cst_38 : f32 to vector<4x128xf32>
      %c0_39 = arith.constant 0 : index
      %c0_40 = arith.constant 0 : index
      %107 = vector.load %arg6[%c0_39, %c0_40] : memref<4x128xf32, #tpu.memory_space<vmem>>, vector<4x128xf32>
      tpu.vector_store %arg6[%c0_39, %c0_40], %106 {strides = array<i32>} : memref<4x128xf32, #tpu.memory_space<vmem>>, vector<4x128xf32>,
    } else {
    }
    %c0 = arith.constant 0 : index
    %c0_1 = arith.constant 0 : index
    %c0_2 = arith.constant 0 : index
    %3 = vector.load %arg2[%c0, %c0_1, %c0_2] : memref<3x4x128xf32, #tpu.memory_space<vmem>>, vector<1x4x128xf32>
    %4 = vector.shape_cast %3 : vector<1x4x128xf32> to vector<4x128xf32>
    %c1 = arith.constant 1 : index
    %c0_3 = arith.constant 0 : index
    %c0_4 = arith.constant 0 : index
    %5 = vector.load %arg2[%c1, %c0_3, %c0_4] : memref<3x4x128xf32, #tpu.memory_space<vmem>>, vector<1x4x128xf32>
    %6 = vector.shape_cast %5 : vector<1x4x128xf32> to vector<4x128xf32>
    %c2 = arith.constant 2 : index
    %c0_5 = arith.constant 0 : index
    %c0_6 = arith.constant 0 : index
    %7 = vector.load %arg2[%c2, %c0_5, %c0_6] : memref<3x4x128xf32, #tpu.memory_space<vmem>>, vector<1x4x128xf32>
    %8 = vector.shape_cast %7 : vector<1x4x128xf32> to vector<4x128xf32>
    %c0_7 = arith.constant 0 : index
    %c0_8 = arith.constant 0 : index
    %9 = vector.load %arg3[%c0_7, %c0_8] : memref<4x128xf32, #tpu.memory_space<vmem>>, vector<4x128xf32>
    %c1_i32 = arith.constant 1 : i32
    %10 = arith.muli %arg0, %c1_i32 : i32
    %11 = arith.addi %10, %arg1 : i32
    %c128_i32 = arith.constant 128 : i32
    %12 = arith.muli %11, %c128_i32 : i32
    %13 = tpu.iota {dimensions = array<i32: 1>} : vector<1x128xi32>
    %14 = vector.broadcast %12 : i32 to vector<1x128xi32>
    %15 = arith.addi %14, %13 : vector<1x128xi32>
    %c50_i32 = arith.constant 50 : i32
    %16 = vector.broadcast %c50_i32 : i32 to vector<1x128xi32>
    %17 = arith.cmpi slt, %15, %16 : vector<1x128xi32>
    %18 = arith.subf %4, %9 : vector<4x128xf32>
    %19 = math.absf %18 : vector<4x128xf32>
    %cst = arith.constant 1.000000e+00 : f32
    %20 = vector.broadcast %cst : f32 to vector<4x128xf32>
    %21 = arith.cmpf olt, %19, %20 : vector<4x128xf32>
    %22 = arith.mulf %19, %19 : vector<4x128xf32>
    %cst_9 = arith.constant 5.000000e-01 : f32
    %23 = vector.broadcast %cst_9 : f32 to vector<4x128xf32>
    %24 = arith.mulf %22, %23 : vector<4x128xf32>
    %cst_10 = arith.constant 5.000000e-01 : f32
    %25 = vector.broadcast %cst_10 : f32 to vector<4x128xf32>
    %26 = arith.subf %19, %25 : vector<4x128xf32>
    %27 = arith.select %21, %24, %26 : vector<4x128xi1>, vector<4x128xf32>
    %c0_11 = arith.constant 0 : index
    %c0_12 = arith.constant 0 : index
    %28 = vector.load %arg5[%c0_11, %c0_12] : memref<4x128xf32, #tpu.memory_space<vmem>>, vector<4x128xf32>
    %cst_13 = arith.constant 0.000000e+00 : f32
    %29 = vector.shape_cast %17 : vector<1x128xi1> to vector<1x128xi1>
    %30 = vector.broadcast %29 : vector<1x128xi1> to vector<4x128xi1>
    %31 = vector.broadcast %cst_13 : f32 to vector<4x128xf32>
    %32 = arith.select %30, %27, %31 : vector<4x128xi1>, vector<4x128xf32>
    %33 = arith.addf %28, %32 : vector<4x128xf32>
    %c0_14 = arith.constant 0 : index
    %c0_15 = arith.constant 0 : index
    %34 = vector.load %arg5[%c0_14, %c0_15] : memref<4x128xf32, #tpu.memory_space<vmem>>, vector<4x128xf32>
    tpu.vector_store %arg5[%c0_14, %c0_15], %33 {strides = array<i32>} : memref<4x128xf32, #tpu.memory_space<vmem>>, vector<4x128xf32>,
    %cst_16 = arith.constant dense<0xFF800000> : vector<128xf32>
    %35 = vector.multi_reduction <maximumf>, %4, %cst_16 [0] : vector<4x128xf32> to vector<128xf32>
    %36 = vector.shape_cast %35 : vector<128xf32> to vector<1x128xf32>
    %37 = vector.broadcast %36 : vector<1x128xf32> to vector<4x128xf32>
    %38 = arith.subf %4, %37 : vector<4x128xf32>
    %39 = math.exp %38 : vector<4x128xf32>
    %cst_17 = arith.constant dense<0.000000e+00> : vector<128xf32>
    %40 = vector.multi_reduction <add>, %39, %cst_17 [0] : vector<4x128xf32> to vector<128xf32>
    %41 = vector.shape_cast %40 : vector<128xf32> to vector<1x128xf32>
    %cst_18 = arith.constant 1.000000e+00 : f32
    %42 = vector.broadcast %cst_18 : f32 to vector<1x128xf32>
    %43 = arith.divf %42, %41 : vector<1x128xf32>
    %44 = vector.broadcast %43 : vector<1x128xf32> to vector<4x128xf32>
    %45 = arith.mulf %39, %44 : vector<4x128xf32>
    %46 = math.log %41 : vector<1x128xf32>
    %47 = vector.broadcast %46 : vector<1x128xf32> to vector<4x128xf32>
    %48 = arith.subf %38, %47 : vector<4x128xf32>
    %cst_19 = arith.constant dense<0xFF800000> : vector<128xf32>
    %49 = vector.multi_reduction <maximumf>, %6, %cst_19 [0] : vector<4x128xf32> to vector<128xf32>
    %50 = vector.shape_cast %49 : vector<128xf32> to vector<1x128xf32>
    %51 = vector.broadcast %50 : vector<1x128xf32> to vector<4x128xf32>
    %52 = arith.subf %6, %51 : vector<4x128xf32>
    %53 = math.exp %52 : vector<4x128xf32>
    %cst_20 = arith.constant dense<0.000000e+00> : vector<128xf32>
    %54 = vector.multi_reduction <add>, %53, %cst_20 [0] : vector<4x128xf32> to vector<128xf32>
    %55 = vector.shape_cast %54 : vector<128xf32> to vector<1x128xf32>
    %cst_21 = arith.constant 1.000000e+00 : f32
    %56 = vector.broadcast %cst_21 : f32 to vector<1x128xf32>
    %57 = arith.divf %56, %55 : vector<1x128xf32>
    %58 = vector.broadcast %57 : vector<1x128xf32> to vector<4x128xf32>
    %59 = arith.mulf %53, %58 : vector<4x128xf32>
    %60 = math.log %55 : vector<1x128xf32>
    %61 = vector.broadcast %60 : vector<1x128xf32> to vector<4x128xf32>
    %62 = arith.subf %52, %61 : vector<4x128xf32>
    %cst_22 = arith.constant dense<0xFF800000> : vector<128xf32>
    %63 = vector.multi_reduction <maximumf>, %8, %cst_22 [0] : vector<4x128xf32> to vector<128xf32>
    %64 = vector.shape_cast %63 : vector<128xf32> to vector<1x128xf32>
    %65 = vector.broadcast %64 : vector<1x128xf32> to vector<4x128xf32>
    %66 = arith.subf %8, %65 : vector<4x128xf32>
    %67 = math.exp %66 : vector<4x128xf32>
    %cst_23 = arith.constant dense<0.000000e+00> : vector<128xf32>
    %68 = vector.multi_reduction <add>, %67, %cst_23 [0] : vector<4x128xf32> to vector<128xf32>
    %69 = vector.shape_cast %68 : vector<128xf32> to vector<1x128xf32>
    %cst_24 = arith.constant 1.000000e+00 : f32
    %70 = vector.broadcast %cst_24 : f32 to vector<1x128xf32>
    %71 = arith.divf %70, %69 : vector<1x128xf32>
    %72 = vector.broadcast %71 : vector<1x128xf32> to vector<4x128xf32>
    %73 = arith.mulf %67, %72 : vector<4x128xf32>
    %74 = math.log %69 : vector<1x128xf32>
    %75 = vector.broadcast %74 : vector<1x128xf32> to vector<4x128xf32>
    %76 = arith.subf %66, %75 : vector<4x128xf32>
    %77 = arith.addf %45, %59 : vector<4x128xf32>
    %78 = arith.addf %77, %73 : vector<4x128xf32>
    %cst_25 = arith.constant 0.333333343 : f32
    %79 = vector.broadcast %cst_25 : f32 to vector<4x128xf32>
    %80 = arith.mulf %78, %79 : vector<4x128xf32>
    %cst_26 = arith.constant 1.000000e-07 : f32
    %cst_27 = arith.constant 1.000000e+00 : f32
    %81 = vector.broadcast %cst_26 : f32 to vector<4x128xf32>
    %82 = arith.maximumf %81, %80 : vector<4x128xf32>
    %83 = vector.broadcast %cst_27 : f32 to vector<4x128xf32>
    %84 = arith.minimumf %83, %82 : vector<4x128xf32>
    %85 = math.log %84 : vector<4x128xf32>
    %86 = arith.subf %48, %85 : vector<4x128xf32>
    %87 = arith.mulf %45, %86 : vector<4x128xf32>
    %88 = arith.subf %62, %85 : vector<4x128xf32>
    %89 = arith.mulf %59, %88 : vector<4x128xf32>
    %90 = arith.addf %87, %89 : vector<4x128xf32>
    %91 = arith.subf %76, %85 : vector<4x128xf32>
    %92 = arith.mulf %73, %91 : vector<4x128xf32>
    %93 = arith.addf %90, %92 : vector<4x128xf32>
    %c0_28 = arith.constant 0 : index
    %c0_29 = arith.constant 0 : index
    %94 = vector.load %arg6[%c0_28, %c0_29] : memref<4x128xf32, #tpu.memory_space<vmem>>, vector<4x128xf32>
    %cst_30 = arith.constant 0.000000e+00 : f32
    %95 = vector.shape_cast %17 : vector<1x128xi1> to vector<1x128xi1>
    %96 = vector.broadcast %95 : vector<1x128xi1> to vector<4x128xi1>
    %97 = vector.broadcast %cst_30 : f32 to vector<4x128xf32>
    %98 = arith.select %96, %93, %97 : vector<4x128xi1>, vector<4x128xf32>
    %99 = arith.addf %94, %98 : vector<4x128xf32>
    %c0_31 = arith.constant 0 : index
    %c0_32 = arith.constant 0 : index
    %100 = vector.load %arg6[%c0_31, %c0_32] : memref<4x128xf32, #tpu.memory_space<vmem>>, vector<4x128xf32>
    tpu.vector_store %arg6[%c0_31, %c0_32], %99 {strides = array<i32>} : memref<4x128xf32, #tpu.memory_space<vmem>>, vector<4x128xf32>,
    %c0_i32_33 = arith.constant 0 : i32
    %101 = arith.cmpi eq, %arg1, %c0_i32_33 : i32
    %102 = arith.extui %101 : i1 to i32
    %c0_i32_34 = arith.constant 0 : i32
    %103 = arith.cmpi ne, %102, %c0_i32_34 : i32
    scf.if %103 {
      %c0_35 = arith.constant 0 : index
      %c0_36 = arith.constant 0 : index
      %104 = vector.load %arg5[%c0_35, %c0_36] : memref<4x128xf32, #tpu.memory_space<vmem>>, vector<4x128xf32>
      %105 = vector.shape_cast %104 : vector<4x128xf32> to vector<1x4x128xf32>
      %cst_37 = arith.constant dense<0.000000e+00> : vector<1xf32>
      %106 = vector.multi_reduction <add>, %105, %cst_37 [1, 2] : vector<1x4x128xf32> to vector<1xf32>
      %107 = vector.shape_cast %106 : vector<1xf32> to vector<1x1x1xf32>
      %108 = vector.extract %107[0, 0, 0] : f32 from vector<1x1x1xf32>
      %c0_38 = arith.constant 0 : index
      %c0_39 = arith.constant 0 : index
      %109 = vector.load %arg6[%c0_38, %c0_39] : memref<4x128xf32, #tpu.memory_space<vmem>>, vector<4x128xf32>
      %110 = vector.shape_cast %109 : vector<4x128xf32> to vector<1x4x128xf32>
      %cst_40 = arith.constant dense<0.000000e+00> : vector<1xf32>
      %111 = vector.multi_reduction <add>, %110, %cst_40 [1, 2] : vector<1x4x128xf32> to vector<1xf32>
      %112 = vector.shape_cast %111 : vector<1xf32> to vector<1x1x1xf32>
      %113 = vector.extract %112[0, 0, 0] : f32 from vector<1x1x1xf32>
      %cst_41 = arith.constant 1.000000e+00 : f32
      %114 = arith.mulf %cst_41, %108 : f32
      %cst_42 = arith.constant 5.000000e-03 : f32
      %115 = arith.mulf %114, %cst_42 : f32
      %cst_43 = arith.constant 9.99999974E-5 : f32
      %116 = arith.mulf %cst_43, %113 : f32
      %cst_44 = arith.constant 0.333333343 : f32
      %117 = arith.mulf %116, %cst_44 : f32
      %118 = arith.addf %115, %117 : f32
      %119 = vector.broadcast %118 : f32 to vector<1x8x128xf32>
      %c0_45 = arith.constant 0 : index
      %c0_46 = arith.constant 0 : index
      %c0_47 = arith.constant 0 : index
      %120 = vector.load %arg4[%c0_45, %c0_46, %c0_47] : memref<1x8x128xf32, #tpu.memory_space<vmem>>, vector<1x8x128xf32>
      tpu.vector_store %arg4[%c0_45, %c0_46, %c0_47], %119 {strides = array<i32>} : memref<1x8x128xf32, #tpu.memory_space<vmem>>, vector<1x8x128xf32>,
    } else {
    }
    return
  }
  func.func @transform_0(%arg0: i32, %arg1: i32) -> (i32, i32, i32) {
    %c1_i32 = arith.constant 1 : i32
    %0 = arith.muli %arg0, %c1_i32 : i32
    %1 = arith.addi %0, %arg1 : i32
    %c0_i32 = arith.constant 0 : i32
    %c0_i32_0 = arith.constant 0 : i32
    %c0_i32_1 = arith.constant 0 : i32
    return %c0_i32, %c0_i32_0, %1 : i32, i32, i32
  }
  func.func @transform_1(%arg0: i32, %arg1: i32) -> (i32, i32) {
    %c1_i32 = arith.constant 1 : i32
    %0 = arith.muli %arg0, %c1_i32 : i32
    %1 = arith.addi %0, %arg1 : i32
    %c0_i32 = arith.constant 0 : i32
    %c0_i32_0 = arith.constant 0 : i32
    return %c0_i32, %1 : i32, i32
  }
  func.func @transform_2(%arg0: i32, %arg1: i32) -> (i32, i32, i32) {
    %c0_i32 = arith.constant 0 : i32
    %c0_i32_0 = arith.constant 0 : i32
    %c0_i32_1 = arith.constant 0 : i32
    return %arg0, %c0_i32, %c0_i32_0 : i32, i32, i32
  }
}

</mosaic_0001>

<bundles_post_ra>
// kernel: smooth_l1_loss_plus.1
= control target key start
LH: loop header
LB: loop body
LE: loop exit
PB: predicated region body
PF: predicated region fallthrough
CT: control target
= control target key end

     0   :  { %s602_s9 = smov 0   ;;  %s604_s10 = smov 0   ;;  %s703_s0 = inlined_call_operand.vmem [shape: f32[3,4,256], index: 0, kind: input, shape index: {}]   ;;  %s704_s1 = inlined_call_operand.vmem [shape: f32[4,256], index: 1, kind: input, shape index: {}]   ;;  %s705_s2 = inlined_call_operand.vmem [shape: f32[2,8,128], index: 2, kind: output, shape index: {}]  }
   0x1   :  { %s606_s11 = smov 0   ;;  %s608_s12 = smov 0  }
   0x2   :  { %s610_s13 = smov 0  }
   0x3 LB: > { %s24_s14 = sadd.s32 1, %s580_s12  ;;  %p40_p1 = scmp.ne.s32.totalorder %s572_s10, %s568_s9  ;;  %s584_s13 = sphi %s610_s13, %s12_s13   ;;  %s580_s12 = sphi %s608_s12, %s709_s12   ;;  %s576_s11 = sphi %s606_s11, %s708_s11   ;;  %s572_s10 = sphi %s604_s10, %s707_s10   ;;  %s568_s9 = sphi %s602_s9, %s706_s9  }
   0x4   : > { %p26_p0 = scmp.ge.s32.totalorder %s24_s14, 2  ;;  %p41_p2 = scmp.eq.s32.totalorder %s584_s13, 0 }
   0x5   : > { %s33_s16 = sadd.s32 1, %s572_s10  ;;  %p468_p5 = scmp.ge.s32.totalorder %s584_s13, 2 }
   0x6   : > { %s711_s14 = smov (%p26_p0, %s24_s14), 0  ;;  %p42_p3 = por %p41_p2, %p40_p1 }
   0x7   : > { %s30_s15 = ssub.s32 %s580_s12, %s711_s14  ;;  %120 = sbr.rel (%p468_p5) target bundleno = 19 (0x13), region = 16 }
   0x8   : > { %p31_p4 = scmp.eq.s32.totalorder %s30_s15, 0 }
   0xa   : > { %s637_s17 = scalar_select %p31_p4, %s572_s10, %s33_s16  }
   0xc   : > { %123 = sbr.rel (!%p42_p3) target bundleno = 19 (0x13), region = 20  ;;  %s125_s18 = sand.u32 (%p42_p3), 1, %s572_s10  }
   0xd   : > { %s469_s19 = sshll.u32 (%p42_p3), %s580_s12, 2  ;;  %s479_s20 = smul.u32 (%p42_p3), 12, %s125_s18 }
   0xe   : > { %s130_s23 = scalar_lea.vmem (%p42_p3), %s703_s0, %s469_s19 }
   0xf   : > { %v147_v0 = vld [vmem:[%s130_s23] sm:$0xf] (%p42_p3)  ;;  %v149_v1 = vld [vmem:[%s130_s23 + $0x8] sm:$0xf] (%p42_p3)  ;;  %v151_v2 = vld [vmem:[%s130_s23 + $0x10] sm:$0xf] (%p42_p3) }
  0x10   : > { %s127_s24 = scalar_lea.vmem (%p42_p3), [#allocation4], %s479_s20 }
  0x11   : > { %148 = vst [vmem:[%s127_s24] sm:$0xf] %v147_v0  ;;  %150 = vst [vmem:[%s127_s24 + $0x4] sm:$0xf] %v149_v1 }
  0x12   : > { %152 = vst [vmem:[%s127_s24 + $0x8] sm:$0xf] %v151_v2 }
  0x13 PF: > { %p470_p6 = scmp.ge.s32.totalorder %s584_s13, 1  ;;  %p190_p7 = scmp.lt.s32.totalorder %s584_s13, 3 }
  0x15   : > { %p191_p8 = pnand %p470_p6, %p190_p7 }
  0x16   : > { %s197_s25 = sand.u32 (!%p191_p8), 1, %s568_s9   ;;  %p224_p9 = scmp.lt.s32.totalorder (!%p191_p8), %s576_s11, 1 }
  0x17   : > { %194 = sbr.rel (%p191_p8) target bundleno = 345 (0x159), region = 65  ;;  %s475_s28 = sshll.u32 (!%p191_p8), %s576_s11, 7 }
  0x18   : > { %s480_s26 = smul.u32 (!%p191_p8), 12, %s197_s25 }
  0x1a   : > { %s199_s30 = scalar_lea.vmem (!%p191_p8), [#allocation4], %s480_s26 }
  0x1c   : > { %v586_v3 = vmov 0.0   ;;  %v247_v4 = vlaneseq  ;;  %s650_s27 = scalar_select %p224_p9, %s576_s11, 1  ;;  %vm265_vm0 = vcmask 1043456   ;;  %v239_v5 = vld [vmem:[%s199_s30] sm:$0xf]  ;;  %v249_v12 = vstv %s475_s28 }
  0x1d   : > { %237 = vst [vmem:[#allocation2] sm:$0xf] %v586_v3  ;;  %238 = vst [vmem:[#allocation3] sm:$0xf] %v586_v3  ;;  %v473_v6 = vld [vmem:[%s199_s30 + $0x4] sm:$0xf] }
  0x1e   : > { %s471_s29 = sshll.u32 %s650_s27, 2  ;;  %v474_v7 = vld [vmem:[%s199_s30 + $0x8] sm:$0xf]  ;;  %v248_v8 = vand.u32 127, %v247_v4  ;;  %v266_v9 = vsel %vm265_vm0, %v239_v5, -inf  ;;  %v289_v10 = vsel %vm265_vm0, %v473_v6, -inf }
  0x1f   : > { %s227_s5 = scalar_lea.vmem %s704_s1, %s471_s29  ;;  %v267_v13 = vrot.slane %v266_v9, 4  ;;  %v290_v14 = vrot.slane %v289_v10, 4  ;;  %v312_v15 = vsel %vm265_vm0, %v474_v7, -inf  ;;  %s472_s11 = sshll.u32 %s650_s27, 3 }
  0x20   : > { %v244_v11 = vld [vmem:[%s227_s5] sm:$0xf]  ;;  %v313_v17 = vrot.slane %v312_v15, 4  ;;  %v660_v20 = vadd.s32 %v249_v12, %v248_v8  ;;  %s232_s19 = scalar_lea.vmem %s705_s2, %s472_s11 }
  0x21   : > { %v252_v16 = vsub.f32 %v239_v5, %v244_v11  ;;  %v268_v18 = vmax.f32 %v266_v9, %v267_v13  ;;  %v291_v19 = vmax.f32 %v289_v10, %v290_v14 }
  0x22   : > { %v314_v22 = vmax.f32 %v312_v15, %v313_v17  ;;  %vm251_vm2 = vcmp.lt.s32.totalorder %v660_v20, 50 }
  0x23   : > { %v253_v21 = vand.u32 2147483647, %v252_v16  ;;  %v269_v23 = vrot.slane %v268_v18, 2  ;;  %v292_v24 = vrot.slane %v291_v19, 2 }
  0x24   : > { %v315_v27 = vrot.slane %v314_v22, 2  ;;  %v259_v32 = vld [vmem:[#allocation2] sm:$0xf] }
  0x25   : > { %v255_v25 = vmul.f32 %v253_v21, %v253_v21  ;;  %v476_v26 = vadd.f32 -0.5, %v253_v21  ;;  %vm254_vm1 = vcmp.lt.f32.partialorder %v253_v21, 1.0  ;;  %v270_v28 = vmax.f32 %v268_v18, %v269_v23 }
  0x26   : > { %v293_v29 = vmax.f32 %v291_v19, %v292_v24  ;;  %v316_v31 = vmax.f32 %v314_v22, %v315_v27 }
  0x27   : > { %v256_v30 = vmul.f32 0.5, %v255_v25  ;;  %v271_v33 = vrot.slane %v270_v28, 1 }
  0x28   : > { %v294_v34 = vrot.slane %v293_v29, 1  ;;  %v317_v36 = vrot.slane %v316_v31, 1 }
  0x29   : > { %v258_v35 = vsel %vm254_vm1, %v256_v30, %v476_v26  ;;  %v272_v38 = vmax.f32 %v270_v28, %v271_v33 }
  0x2a   : > { %v262_v37 = vsel %vm251_vm2, %v258_v35, 0.0  ;;  %v295_v39 = vmax.f32 %v293_v29, %v294_v34  ;;  %v318_v41 = vmax.f32 %v316_v31, %v317_v36 }
  0x2b   : > { %v263_v40 = vadd.f32 %v262_v37, %v259_v32  ;;  %v665_v42 = vsub.f32 %v239_v5, %v272_v38 }
  0x2c   : > { %v667_v43 = vsub.f32 %v473_v6, %v295_v39  ;;  %v669_v44 = vsub.f32 %v474_v7, %v318_v41  ;;  %v350_v41 = vld [vmem:[#allocation3] sm:$0xf] }
  0x2d   : > { %264 = vst [vmem:[#allocation2] sm:$0xf] %v263_v40  ;;  %v274_v45 = vmul.f32 1.442695, %v665_v42 }
  0x2e   : > { %v297_v46 = vmul.f32 1.442695, %v667_v43  ;;  %v320_v47 = vmul.f32 1.442695, %v669_v44 }
  0x2f   : > { %526 = vpow2.f32 %v274_v45 }
  0x30   : > { %528 = vpow2.f32 %v297_v46 }
  0x31   : > { %530 = vpow2.f32 %v320_v47 }
  0x34   : > { %v357_v48 = vld [vmem:[#allocation2] sm:$0xf] }
  0x35   : > { %v358_v49 = vsel %vm265_vm0, %v357_v48, 0.0 }
  0x36   : > { %359 = vadd.xlane.f32.xlu0 %v358_v49 }
  0x3c   : > { %v527_v50 = vpop.eup %526 }
  0x3d   : > { %v529_v51 = vpop.eup %528  ;;  %v276_v52 = vsel %vm265_vm0, %v527_v50, 0.0 }
  0x3e   : > { %v531_v53 = vpop.eup %530  ;;  %v277_v54 = vrot.slane %v276_v52, 4  ;;  %v299_v55 = vsel %vm265_vm0, %v529_v51, 0.0 }
  0x3f   : > { %v300_v56 = vrot.slane %v299_v55, 4  ;;  %v322_v57 = vsel %vm265_vm0, %v531_v53, 0.0 }
  0x40   : > { %v278_v58 = vadd.f32 %v277_v54, %v276_v52  ;;  %v323_v59 = vrot.slane %v322_v57, 4 }
  0x41   : > { %v301_v60 = vadd.f32 %v300_v56, %v299_v55 }
  0x42   : > { %v279_v61 = vrot.slane %v278_v58, 2  ;;  %v324_v62 = vadd.f32 %v323_v59, %v322_v57 }
  0x43   : > { %v302_v63 = vrot.slane %v301_v60, 2 }
  0x44   : > { %v280_v0 = vadd.f32 %v279_v61, %v278_v58  ;;  %v325_v1 = vrot.slane %v324_v62, 2 }
  0x45   : > { %v303_v2 = vadd.f32 %v302_v63, %v301_v60 }
  0x46   : > { %v281_v3 = vrot.slane %v280_v0, 1  ;;  %v326_v4 = vadd.f32 %v325_v1, %v324_v62 }
  0x47   : > { %v304_v5 = vrot.slane %v303_v2, 1 }
  0x48   : > { %v282_v6 = vadd.f32 %v281_v3, %v280_v0  ;;  %v327_v7 = vrot.slane %v326_v4, 1 }
  0x49   : > { %v305_v8 = vadd.f32 %v304_v5, %v303_v2 }
  0x4a   : > { %532 = vrcp.f32 %v282_v6  ;;  %v328_v9 = vadd.f32 %v327_v7, %v326_v4 }
  0x4b   : > { %534 = vrcp.f32 %v305_v8 }
  0x4c   : > { %536 = vrcp.f32 %v328_v9 }
  0x4d   : > { %538 = vlog2.f32 %v282_v6 }
  0x4e   : > { %540 = vlog2.f32 %v305_v8 }
  0x4f   : > { %542 = vlog2.f32 %v328_v9 }
  0x57   : > { %v533_v10 = vpop.eup %532 }
  0x58   : > { %v285_v11 = vmul.f32 %v533_v10, %v527_v50  ;;  %v535_v12 = vpop.eup %534 }
  0x59   : > { %v308_v13 = vmul.f32 %v535_v12, %v529_v51  ;;  %v537_v14 = vpop.eup %536 }
  0x5a   : > { %v331_v15 = vmul.f32 %v537_v14, %v531_v53  ;;  %v539_v22 = vpop.eup %538 }
  0x5b   : > { %v335_v16 = vadd.f32 %v308_v13, %v285_v11  ;;  %v541_v23 = vpop.eup %540  ;;  %v287_v25 = vmul.f32 0.6931472, %v539_v22 }
  0x5c   : > { %v543_v24 = vpop.eup %542  ;;  %v310_v26 = vmul.f32 0.6931472, %v541_v23 }
  0x5d   : > { %v336_v17 = vadd.f32 %v335_v16, %v331_v15  ;;  %v333_v27 = vmul.f32 0.6931472, %v543_v24  ;;  %v288_v28 = vsub.f32 %v665_v42, %v287_v25 }
  0x5e   : > { %v311_v29 = vsub.f32 %v667_v43, %v310_v26 }
  0x5f   : > { %v337_v18 = vmul.f32 0.33333334, %v336_v17  ;;  %v334_v30 = vsub.f32 %v669_v44, %v333_v27 }
  0x61   : > { %v338_v19 = vmax.f32 %v337_v18, 1e-07 }
  0x63   : > { %v339_v21 = vmin.f32 %v338_v19, 1.0 }
  0x65   : > { %544 = vlog2.f32 %v339_v21 }
  0x72   : > { %v545_v31 = vpop.eup %544 }
  0x73   : > { %v341_v32 = vmul.f32 0.6931472, %v545_v31 }
  0x75   : > { %v342_v33 = vsub.f32 %v288_v28, %v341_v32  ;;  %v344_v34 = vsub.f32 %v311_v29, %v341_v32  ;;  %v347_v35 = vsub.f32 %v334_v30, %v341_v32 }
  0x77   : > { %v343_v36 = vmul.f32 %v342_v33, %v285_v11  ;;  %v345_v37 = vmul.f32 %v344_v34, %v308_v13  ;;  %v348_v38 = vmul.f32 %v347_v35, %v331_v15 }
  0x79   : > { %v346_v39 = vadd.f32 %v345_v37, %v343_v36 }
  0x7b   : > { %v349_v40 = vadd.f32 %v348_v38, %v346_v39 }
  0x7d   : > { %v351_v45 = vsel %vm251_vm2, %v349_v40, 0.0 }
  0x7e   : > { %v352_v46 = vadd.f32 %v351_v45, %v350_v41 }
  0x80   : > { %353 = vst [vmem:[#allocation3] sm:$0xf] %v352_v46 }
  0x87   : > { %v368_v42 = vld [vmem:[#allocation3] sm:$0xf] }
  0x88   : > { %v369_v43 = vsel %vm265_vm0, %v368_v42, 0.0 }
  0x89   : > { %370 = vadd.xlane.f32.xlu0 %v369_v43 }
  0xbf   : > { %v360_v44 = vpop.xlane.xlu0 %359 }
  0xc0   : > { %v361_v47 = vrot.slane %v360_v44, 4 }
  0xc2   : > { %v362_v48 = vadd.f32 %v361_v47, %v360_v44 }
  0xc4   : > { %v363_v49 = vrot.slane %v362_v48, 2 }
  0xc6   : > { %v364_v50 = vadd.f32 %v363_v49, %v362_v48 }
  0xc8   : > { %v365_v51 = vrot.slane %v364_v50, 1 }
  0xca   : > { %v366_v52 = vadd.f32 %v365_v51, %v364_v50 }
  0xcc   : > { %481 = vpush %v366_v52 }
  0xfd   : > { %s482_s6 = spop %481 }
  0xfe   : > { %s379_s9 = smul.f32 0.005, %s482_s6 }
 0x112   : > { %v371_v53 = vpop.xlane.xlu0 %370 }
 0x113   : > { %v372_v54 = vrot.slane %v371_v53, 4 }
 0x115   : > { %v373_v55 = vadd.f32 %v372_v54, %v371_v53 }
 0x117   : > { %v374_v20 = vrot.slane %v373_v55, 2 }
 0x119   : > { %v375_v56 = vadd.f32 %v374_v20, %v373_v55 }
 0x11b   : > { %v376_v57 = vrot.slane %v375_v56, 1 }
 0x11d   : > { %v377_v58 = vadd.f32 %v376_v57, %v375_v56 }
 0x11f   : > { %483 = vpush %v377_v58 }
 0x150   : > { %s484_s7 = spop %483 }
 0x151   : > { %s380_s8 = smul.f32 0.0001, %s484_s7 }
 0x153   : > { %s381_s15 = smul.f32 0.33333334, %s380_s8 }
 0x155   : > { %s382_s20 = sadd.f32 %s381_s15, %s379_s9 }
 0x157   : > { %v383_v59 = vstv %s382_s20 }
 0x158   : > { %384 = vst [vmem:[%s232_s19] sm:$0xff] %v383_v59 }
 0x159 PF: > { %s12_s13 = sadd.s32 1, %s584_s13   ;;  %s706_s9 = smov %s572_s10 }
 0x15a   : > { %p9_p10 = scmp.ge.s32.totalorder %s12_s13, 4   ;;  %s707_s10 = smov %s637_s17 }
 0x15b   : > { %s708_s11 = smov %s580_s12  ;;  %s709_s12 = smov %s711_s14 }
 0x15c   :  { %11 = sbr.rel (!%p9_p10) target bundleno = 3 (0x3), region = 117 }

</bundles_post_ra>
